<compile_context>
chip_gen: v7x
topology: tpu7x:2x2x1
jax: 0.10.0
libtpu: 0.0.40
codegen_flags: <defaults>
</compile_context>

<pallas_src>
import math
import functools

import jax
import jax.numpy as jnp
from jax.experimental import pallas as pl
from jax.experimental.pallas import tpu as pltpu


# ----------------------------- Pallas kernel ------------------------------ #

def encoder_stack_kernel(x_ref, wqkv_ref, bqkv_ref, wo_ref, bo_ref,
                         wf_ref, bf_ref, o_ref, xa_ref, *, n_heads):
    """One grid step = (one batch block, one encoder layer).

    x_ref   : (Bt, S, D)  bf16 input activations (consumed at layer 0 only)
    wqkv_ref: (1, D, 3D)  bf16 fused, head-major QKV weight (Q pre-scaled by 1/sqrt(dh))
    bqkv_ref: (1, 1, 3D)  f32  matching fused bias
    wo_ref  : (1, D, D)   bf16 attention output projection
    bo_ref  : (1, 1, D)   f32
    wf_ref  : (1, D, D)   bf16 feed-forward linear
    bf_ref  : (1, 1, D)   f32
    o_ref   : (Bt, S, D)  f32 output (written at the last layer only)
    xa_ref  : (Bt*S, D)   f32 VMEM scratch: layer-resident activation
    """
    layer = pl.program_id(1)
    n_layers = pl.num_programs(1)

    Bt, S, D = x_ref.shape
    H = n_heads
    dh = D // H
    R = Bt * S

    # Load the activation into the layer-resident scratch once per batch block.
    @pl.when(layer == 0)
    def _init():
        xa_ref[...] = x_ref[...].reshape(R, D).astype(jnp.float32)

    x = xa_ref[...]                                   # (R, D) f32
    xb = x.astype(jnp.bfloat16)

    # ---- fused QKV projection (Q columns already carry 1/sqrt(dh)) ----
    qkv = jnp.dot(xb, wqkv_ref[0], preferred_element_type=jnp.float32)
    qkv = qkv + bqkv_ref[0]                           # (R, 3D) f32, head-major columns

    # ---- form the head batch: H wide slices + one concat (host-permuted cols) ----
    hqkv = jnp.concatenate(
        [qkv[:, h * 3 * dh:(h + 1) * 3 * dh].reshape(Bt, S, 3 * dh)
         for h in range(H)], axis=0)                  # (H*Bt, S, 3dh) f32
    qh = hqkv[..., 0 * dh:1 * dh].astype(jnp.bfloat16)
    kh = hqkv[..., 1 * dh:2 * dh].astype(jnp.bfloat16)
    vh = hqkv[..., 2 * dh:3 * dh].astype(jnp.bfloat16)

    # ---- attention (mask is None in Encoder.forward) ----
    s = jnp.einsum("bqd,bkd->bqk", qh, kh,
                   preferred_element_type=jnp.float32)          # (H*Bt, S, S)
    s = s - jnp.max(s, axis=-1, keepdims=True)
    p = jnp.exp(s)                                              # unnormalized, in (0, 1]
    inv_l = pl.reciprocal(jnp.sum(p, axis=-1, keepdims=True), approx=True)
    ctx = jnp.einsum("bqk,bkd->bqd", p.astype(jnp.bfloat16), vh,
                     preferred_element_type=jnp.float32)        # (H*Bt, S, dh)
    ctx = ctx * inv_l                                           # deferred softmax normalization

    # ---- merge heads back to a lane-dense (R, D) slab (head-major == wo rows) ----
    attn = jnp.concatenate(
        [ctx[h * Bt:(h + 1) * Bt].reshape(R, dh) for h in range(H)], axis=-1)

    # ---- output projection + residual ----
    x1 = (jnp.dot(attn.astype(jnp.bfloat16), wo_ref[0],
                  preferred_element_type=jnp.float32) + bo_ref[0] + x)
    # ---- feed-forward linear + residual ----
    x2 = (jnp.dot(x1.astype(jnp.bfloat16), wf_ref[0],
                  preferred_element_type=jnp.float32) + bf_ref[0] + x1)

    # Keep the activation resident for the next layer.
    xa_ref[...] = x2

    @pl.when(layer == n_layers - 1)
    def _finalize():
        o_ref[...] = x2.reshape(Bt, S, D).astype(o_ref.dtype)


# --------------------- VMEM-budget-driven block picking -------------------- #

def _vmem_capacity_bytes():
    try:
        return int(pltpu.get_tpu_info().vmem_capacity_bytes)
    except Exception:
        return 64 * 1024 * 1024      # conservative fallback: v7x per-core VMEM


def _step_vmem_bytes(Bt, S, D, H):
    """Conservative per-grid-step VMEM footprint of encoder_stack_kernel."""
    R = Bt * S
    w = 2 * (5 * D * D) * 2                  # double-buffered bf16 weights (3D^2 + D^2 + D^2)
    b = 2 * (5 * D) * 4                      # double-buffered f32 biases
    io = 2 * R * D * 2 + 2 * R * D * 4       # bf16 in block + f32 out block, double-buffered
    scratch = R * D * 4                      # xa_ref
    interm = (R * 3 * D * 4                  # qkv (f32)
              + R * 3 * D * 4                # head-batched qkv copy (f32)
              + 3 * R * D * 2                # q/k/v (bf16)
              + 3 * H * Bt * S * S * 4       # scores / exp / probs (f32, conservative)
              + H * Bt * S * S * 2           # probs (bf16)
              + 4 * R * D * 4)               # ctx / attn / x1 / x2 (f32)
    return w + b + io + scratch + interm


def _pick_block_b(B, S, D, H, budget_bytes):
    """Largest divisor of B whose working set fits the VMEM budget, preferring
    >= 2 batch blocks (so the 'parallel' axis can use both v7x TensorCores) and
    MXU-friendly (multiple-of-256) row counts when available."""
    divisors = [d for d in range(1, B + 1) if B % d == 0]
    fitting = [d for d in divisors if _step_vmem_bytes(d, S, D, H) <= budget_bytes]
    if not fitting:
        fitting = [1]
    cand = [d for d in fitting if B // d >= 2] or fitting
    mxu = [d for d in cand if (d * S) % 256 == 0]
    return max(mxu or cand)


# ------------------------------- wrapper ----------------------------------- #

def encoder_stack(x, wqkv, bqkv, wo, bo, wf, bf, *, n_heads, block_b=None):
    """x: (B, S, D); stacked per-layer params with a leading layer axis."""
    B, S, D = x.shape
    L = wqkv.shape[0]
    H = n_heads
    assert D % H == 0, "d_model must be divisible by n_heads"
    dh = D // H

    cap = _vmem_capacity_bytes()
    budget = int(0.75 * cap)
    Bt = _pick_block_b(B, S, D, H, budget) if block_b is None else block_b
    assert B % Bt == 0
    nb = B // Bt

    vmem_limit = int(min(cap, max(32 * 1024 * 1024,
                                  1.25 * _step_vmem_bytes(Bt, S, D, H))))

    kernel = functools.partial(encoder_stack_kernel, n_heads=H)

    flops = int(L * (2 * B * S * D * 3 * D            # fused QKV
                     + 4 * B * H * S * S * dh          # scores + context
                     + 4 * B * S * D * D))             # out proj + feed-forward
    transcendentals = int(L * B * H * S * S)
    bytes_accessed = int(
        B * S * D * (2 + 4)                            # bf16 activations in, f32 out
        + nb * L * (5 * D * D) * 2                     # bf16 weights, re-streamed per batch block
        + nb * L * (5 * D) * 4)                        # f32 biases

    return pl.pallas_call(
        kernel,
        out_shape=jax.ShapeDtypeStruct((B, S, D), jnp.float32),
        grid_spec=pltpu.PrefetchScalarGridSpec(
            num_scalar_prefetch=0,
            grid=(nb, L),
            in_specs=[
                pl.BlockSpec((Bt, S, D), lambda b, l: (b, 0, 0)),
                pl.BlockSpec((1, D, 3 * D), lambda b, l: (l, 0, 0)),
                pl.BlockSpec((1, 1, 3 * D), lambda b, l: (l, 0, 0)),
                pl.BlockSpec((1, D, D), lambda b, l: (l, 0, 0)),
                pl.BlockSpec((1, 1, D), lambda b, l: (l, 0, 0)),
                pl.BlockSpec((1, D, D), lambda b, l: (l, 0, 0)),
                pl.BlockSpec((1, 1, D), lambda b, l: (l, 0, 0)),
            ],
            out_specs=pl.BlockSpec((Bt, S, D), lambda b, l: (b, 0, 0)),
            scratch_shapes=[pltpu.VMEM((Bt * S, D), jnp.float32)],
        ),
        compiler_params=pltpu.CompilerParams(
            dimension_semantics=("parallel", "arbitrary"),
            vmem_limit_bytes=vmem_limit),
        cost_estimate=pl.CostEstimate(flops=flops,
                                      transcendentals=transcendentals,
                                      bytes_accessed=bytes_accessed),
    )(x.astype(jnp.bfloat16), wqkv, bqkv, wo, bo, wf, bf)


# ------------------------------ JAX glue ---------------------------------- #

def sinusoidal_pe(seq_len, d_model):
    pos = jnp.arange(seq_len, dtype=jnp.float32)[:, None]                 # (S, 1)
    div = jnp.exp(jnp.arange(0, d_model, 2, dtype=jnp.float32)
                  * (-math.log(10000.0) / d_model))                       # (ceil(D/2),)
    pe = jnp.zeros((seq_len, d_model), jnp.float32)
    pe = pe.at[:, 0::2].set(jnp.sin(pos * div))
    pe = pe.at[:, 1::2].set(jnp.cos(pos * div)[:, :d_model // 2])         # odd-D safe
    return pe                                                             # (S, D)


def init_params(key, vocab_size, d_model, n_layers):
    keys = jax.random.split(key, 1 + n_layers)
    emb = jax.random.normal(keys[0], (vocab_size, d_model), jnp.float32) * 0.02
    w_scale = 0.5 / math.sqrt(d_model)

    layers = []
    for l in range(n_layers):
        lk = jax.random.split(keys[1 + l], 10)

        def w(k):
            return jax.random.normal(k, (d_model, d_model), jnp.float32) * w_scale

        def b(k):
            return jax.random.normal(k, (1, d_model), jnp.float32) * 0.01

        layers.append(dict(wq=w(lk[0]), bq=b(lk[1]), wk=w(lk[2]), bk=b(lk[3]),
                           wv=w(lk[4]), bv=b(lk[5]), wo=w(lk[6]), bo=b(lk[7]),
                           wf=w(lk[8]), bf=b(lk[9])))
    return emb, layers


def pack_layers(layers, n_heads):
    """Stack per-layer params into fused, TPU-friendly tensors.

    * QKV columns are permuted head-major: [q_h | k_h | v_h] per head, so the
      kernel needs only wide per-head slices (no per-head concat of 3 tensors).
    * 1/sqrt(dh) is folded into the Q weight and bias (no in-kernel scaling).
    * Weights bf16, biases f32.
    """
    d_model = layers[0]["wq"].shape[0]
    dh = d_model // n_heads
    q_scale = 1.0 / math.sqrt(dh)

    def fuse_w(wq, wk, wv):
        parts = [w.reshape(d_model, n_heads, dh) for w in (wq, wk, wv)]
        return jnp.concatenate(parts, axis=-1).reshape(d_model, 3 * d_model)

    def fuse_b(bq, bk, bv):
        parts = [b.reshape(1, n_heads, dh) for b in (bq, bk, bv)]
        return jnp.concatenate(parts, axis=-1).reshape(1, 3 * d_model)

    wqkv = jnp.stack([fuse_w(p["wq"] * q_scale, p["wk"], p["wv"])
                      for p in layers]).astype(jnp.bfloat16)       # (L, D, 3D)
    bqkv = jnp.stack([fuse_b(p["bq"] * q_scale, p["bk"], p["bv"])
                      for p in layers]).astype(jnp.float32)        # (L, 1, 3D)
    wo = jnp.stack([p["wo"] for p in layers]).astype(jnp.bfloat16)  # (L, D, D)
    bo = jnp.stack([p["bo"] for p in layers]).astype(jnp.float32)   # (L, 1, D)
    wf = jnp.stack([p["wf"] for p in layers]).astype(jnp.bfloat16)  # (L, D, D)
    bf = jnp.stack([p["bf"] for p in layers]).astype(jnp.float32)   # (L, 1, D)
    return wqkv, bqkv, wo, bo, wf, bf


def encoder_forward(tokens, emb, layers, n_heads):
    """tokens: (B, S) int32 -> (B, S, D) float32."""
    d_model = emb.shape[1]
    # TokenEmbedding (gather) and PositionalEncoding add are plain-JAX glue.
    # Dropout is identity in eval / deterministic forward.
    x = jnp.take(emb, tokens, axis=0) * math.sqrt(d_model)               # (B, S, D)
    x = x + sinusoidal_pe(tokens.shape[1], d_model)[None, :, :]
    packed = pack_layers(layers, n_heads)
    return encoder_stack(x, *packed, n_heads=n_heads)


# -------------------------- reference (pure JAX, f32) ----------------------- #

def encoder_forward_ref(tokens, emb, layers, n_heads):
    d_model = emb.shape[1]
    dh = d_model // n_heads
    x = jnp.take(emb, tokens, axis=0) * math.sqrt(d_model)
    x = x + sinusoidal_pe(tokens.shape[1], d_model)[None, :, :]
    for p in layers:
        wq, bq, wk, bk = p["wq"], p["bq"], p["wk"], p["bk"]
        wv, bv, wo, bo = p["wv"], p["bv"], p["wo"], p["bo"]
        wf, bf = p["wf"], p["bf"]
        q = x @ wq + bq
        k = x @ wk + bk
        v = x @ wv + bv
        B, S, D = x.shape
        qh = q.reshape(B, S, n_heads, dh).transpose(0, 2, 1, 3)
        kh = k.reshape(B, S, n_heads, dh).transpose(0, 2, 1, 3)
        vh = v.reshape(B, S, n_heads, dh).transpose(0, 2, 1, 3)
        s = jnp.einsum("bhqd,bhkd->bhqk", qh, kh) / math.sqrt(dh)
        pr = jax.nn.softmax(s, axis=-1)
        o = jnp.einsum("bhqk,bhkd->bhqd", pr, vh)
        o = o.transpose(0, 2, 1, 3).reshape(B, S, D)
        x = o @ wo + bo + x
        x = x @ wf + bf + x
    return x


# --------------------------------- main ------------------------------------ #

if __name__ == "__main__":
    vocab_size, d_model, n_heads, n_layers = 50, 32, 4, 2
    B, S = 2, 8

    key = jax.random.PRNGKey(0)
    pkey, tkey = jax.random.split(key)
    emb, layers = init_params(pkey, vocab_size, d_model, n_layers)
    tokens = jax.random.randint(tkey, (B, S), 0, vocab_size, dtype=jnp.int32)

    out = encoder_forward(tokens, emb, layers, n_heads)
    out = jax.block_until_ready(out)

    ref = encoder_forward_ref(tokens, emb, layers, n_heads)
    assert out.shape == (B, S, d_model)
    max_err = float(jnp.max(jnp.abs(out - ref)))
    # bf16 weights/activations + approx reciprocal vs the f32 reference.
    assert jnp.allclose(out, ref, atol=5e-2, rtol=5e-2), (
        f"mismatch vs JAX reference (max abs err = {max_err})")

    print("KERNEL_OK")
</pallas_src>

<mosaic_0001>
module attributes {stable_mosaic.version = 11 : i64} {
  func.func @encoder_stack_kernel(%arg0: i32, %arg1: i32, %arg2: memref<1x8x32xbf16, #tpu.memory_space<vmem>>, %arg3: memref<1x32x96xbf16, #tpu.memory_space<vmem>>, %arg4: memref<1x1x96xf32, #tpu.memory_space<vmem>>, %arg5: memref<1x32x32xbf16, #tpu.memory_space<vmem>>, %arg6: memref<1x1x32xf32, #tpu.memory_space<vmem>>, %arg7: memref<1x32x32xbf16, #tpu.memory_space<vmem>>, %arg8: memref<1x1x32xf32, #tpu.memory_space<vmem>>, %arg9: memref<1x8x32xf32, #tpu.memory_space<vmem>>, %arg10: memref<8x32xf32, #tpu.memory_space<vmem>>) attributes {dimension_semantics = [#tpu.dimension_semantics<parallel>, #tpu.dimension_semantics<arbitrary>], iteration_bounds = array<i64: 2, 2>, scalar_prefetch = 0 : i64, scratch_operands = 1 : i64, tpu.core_type = #tpu.core_type<tc>, window_params = [{transform_indices = @transform_0, window_bounds = array<i64: 1, 8, 32>}, {transform_indices = @transform_1, window_bounds = array<i64: 1, 32, 96>}, {transform_indices = @transform_2, window_bounds = array<i64: 1, 1, 96>}, {transform_indices = @transform_3, window_bounds = array<i64: 1, 32, 32>}, {transform_indices = @transform_4, window_bounds = array<i64: 1, 1, 32>}, {transform_indices = @transform_5, window_bounds = array<i64: 1, 32, 32>}, {transform_indices = @transform_6, window_bounds = array<i64: 1, 1, 32>}, {transform_indices = @transform_7, window_bounds = array<i64: 1, 8, 32>}]} {
    %c0_i32 = arith.constant 0 : i32
    %0 = arith.cmpi eq, %arg1, %c0_i32 : i32
    %1 = arith.extui %0 : i1 to i32
    %c0_i32_0 = arith.constant 0 : i32
    %2 = arith.cmpi ne, %1, %c0_i32_0 : i32
    scf.if %2 {
      %c0_29 = arith.constant 0 : index
      %c0_30 = arith.constant 0 : index
      %c0_31 = arith.constant 0 : index
      %71 = vector.load %arg2[%c0_29, %c0_30, %c0_31] : memref<1x8x32xbf16, #tpu.memory_space<vmem>>, vector<1x8x32xbf16>
      %72 = vector.shape_cast %71 : vector<1x8x32xbf16> to vector<8x32xbf16>
      %73 = arith.extf %72 : vector<8x32xbf16> to vector<8x32xf32>
      %c0_32 = arith.constant 0 : index
      %c0_33 = arith.constant 0 : index
      %74 = vector.load %arg10[%c0_32, %c0_33] : memref<8x32xf32, #tpu.memory_space<vmem>>, vector<8x32xf32>
      tpu.vector_store %arg10[%c0_32, %c0_33], %73 {strides = array<i32>} : memref<8x32xf32, #tpu.memory_space<vmem>>, vector<8x32xf32>,
    } else {
    }
    %c0 = arith.constant 0 : index
    %c0_1 = arith.constant 0 : index
    %3 = vector.load %arg10[%c0, %c0_1] : memref<8x32xf32, #tpu.memory_space<vmem>>, vector<8x32xf32>
    %4 = arith.truncf %3 : vector<8x32xf32> to vector<8x32xbf16>
    %c0_2 = arith.constant 0 : index
    %c0_3 = arith.constant 0 : index
    %c0_4 = arith.constant 0 : index
    %5 = vector.load %arg3[%c0_2, %c0_3, %c0_4] : memref<1x32x96xbf16, #tpu.memory_space<vmem>>, vector<1x32x96xbf16>
    %6 = vector.shape_cast %5 : vector<1x32x96xbf16> to vector<32x96xbf16>
    %cst = arith.constant dense<0.000000e+00> : vector<8x96xf32>
    %7 = tpu.matmul %4, %6, %cst {dimension_numbers = #tpu.dot_dimension_numbers<[1], [0], [0], [1], [0, 0, 1, 1], [], []>} : vector<8x32xbf16>, vector<32x96xbf16>, vector<8x96xf32> -> vector<8x96xf32>
    %c0_5 = arith.constant 0 : index
    %c0_6 = arith.constant 0 : index
    %c0_7 = arith.constant 0 : index
    %8 = vector.load %arg4[%c0_5, %c0_6, %c0_7] : memref<1x1x96xf32, #tpu.memory_space<vmem>>, vector<1x1x96xf32>
    %9 = vector.shape_cast %8 : vector<1x1x96xf32> to vector<1x96xf32>
    %10 = vector.broadcast %9 : vector<1x96xf32> to vector<8x96xf32>
    %11 = arith.addf %7, %10 : vector<8x96xf32>
    %12 = vector.extract_strided_slice %11 {offsets = [0, 0], sizes = [8, 24], strides = [1, 1]} : vector<8x96xf32> to vector<8x24xf32>
    %13 = vector.shape_cast %12 : vector<8x24xf32> to vector<1x8x24xf32>
    %14 = vector.extract_strided_slice %11 {offsets = [0, 24], sizes = [8, 24], strides = [1, 1]} : vector<8x96xf32> to vector<8x24xf32>
    %15 = vector.shape_cast %14 : vector<8x24xf32> to vector<1x8x24xf32>
    %16 = vector.extract_strided_slice %11 {offsets = [0, 48], sizes = [8, 24], strides = [1, 1]} : vector<8x96xf32> to vector<8x24xf32>
    %17 = vector.shape_cast %16 : vector<8x24xf32> to vector<1x8x24xf32>
    %18 = vector.extract_strided_slice %11 {offsets = [0, 72], sizes = [8, 24], strides = [1, 1]} : vector<8x96xf32> to vector<8x24xf32>
    %19 = vector.shape_cast %18 : vector<8x24xf32> to vector<1x8x24xf32>
    %20 = tpu.concatenate %13, %15, %17, %19 in 0 : vector<1x8x24xf32>, vector<1x8x24xf32>, vector<1x8x24xf32>, vector<1x8x24xf32> -> vector<4x8x24xf32>
    %21 = vector.extract_strided_slice %20 {offsets = [0, 0, 0], sizes = [4, 8, 8], strides = [1, 1, 1]} : vector<4x8x24xf32> to vector<4x8x8xf32>
    %22 = arith.truncf %21 : vector<4x8x8xf32> to vector<4x8x8xbf16>
    %23 = vector.extract_strided_slice %20 {offsets = [0, 0, 8], sizes = [4, 8, 8], strides = [1, 1, 1]} : vector<4x8x24xf32> to vector<4x8x8xf32>
    %24 = arith.truncf %23 : vector<4x8x8xf32> to vector<4x8x8xbf16>
    %25 = vector.extract_strided_slice %20 {offsets = [0, 0, 16], sizes = [4, 8, 8], strides = [1, 1, 1]} : vector<4x8x24xf32> to vector<4x8x8xf32>
    %26 = arith.truncf %25 : vector<4x8x8xf32> to vector<4x8x8xbf16>
    "tpu.trace_start"() <{level = 10 : i32, message = "bqd,bkd->bqk"}> : () -> ()
    %cst_8 = arith.constant dense<0.000000e+00> : vector<4x8x8xf32>
    %27 = tpu.matmul %22, %24, %cst_8 {dimension_numbers = #tpu.dot_dimension_numbers<[2], [2], [1], [1], [0, 0, 0, 1, 1, 1], [0], [0]>} : vector<4x8x8xbf16>, vector<4x8x8xbf16>, vector<4x8x8xf32> -> vector<4x8x8xf32>
    "tpu.trace_stop"() : () -> ()
    %cst_9 = arith.constant dense<0xFF800000> : vector<4x8xf32>
    %28 = vector.multi_reduction <maximumf>, %27, %cst_9 [2] : vector<4x8x8xf32> to vector<4x8xf32>
    %29 = vector.shape_cast %28 : vector<4x8xf32> to vector<4x8x1xf32>
    %30 = vector.broadcast %29 : vector<4x8x1xf32> to vector<4x8x8xf32>
    %31 = arith.subf %27, %30 : vector<4x8x8xf32>
    %32 = math.exp %31 : vector<4x8x8xf32>
    %cst_10 = arith.constant dense<0.000000e+00> : vector<4x8xf32>
    %33 = vector.multi_reduction <add>, %32, %cst_10 [2] : vector<4x8x8xf32> to vector<4x8xf32>
    %34 = vector.shape_cast %33 : vector<4x8xf32> to vector<4x8x1xf32>
    %35 = tpu.reciprocal %34 {approx = true} : vector<4x8x1xf32> -> vector<4x8x1xf32>
    %36 = arith.truncf %32 : vector<4x8x8xf32> to vector<4x8x8xbf16>
    "tpu.trace_start"() <{level = 10 : i32, message = "bqk,bkd->bqd"}> : () -> ()
    %cst_11 = arith.constant dense<0.000000e+00> : vector<4x8x8xf32>
    %37 = tpu.matmul %36, %26, %cst_11 {dimension_numbers = #tpu.dot_dimension_numbers<[2], [1], [1], [2], [0, 0, 0, 1, 1, 2], [0], [0]>} : vector<4x8x8xbf16>, vector<4x8x8xbf16>, vector<4x8x8xf32> -> vector<4x8x8xf32>
    "tpu.trace_stop"() : () -> ()
    %38 = vector.broadcast %35 : vector<4x8x1xf32> to vector<4x8x8xf32>
    %39 = arith.mulf %37, %38 : vector<4x8x8xf32>
    %40 = vector.extract_strided_slice %39 {offsets = [0, 0, 0], sizes = [1, 8, 8], strides = [1, 1, 1]} : vector<4x8x8xf32> to vector<1x8x8xf32>
    %41 = vector.shape_cast %40 : vector<1x8x8xf32> to vector<8x8xf32>
    %42 = vector.extract_strided_slice %39 {offsets = [1, 0, 0], sizes = [1, 8, 8], strides = [1, 1, 1]} : vector<4x8x8xf32> to vector<1x8x8xf32>
    %43 = vector.shape_cast %42 : vector<1x8x8xf32> to vector<8x8xf32>
    %44 = vector.extract_strided_slice %39 {offsets = [2, 0, 0], sizes = [1, 8, 8], strides = [1, 1, 1]} : vector<4x8x8xf32> to vector<1x8x8xf32>
    %45 = vector.shape_cast %44 : vector<1x8x8xf32> to vector<8x8xf32>
    %46 = vector.extract_strided_slice %39 {offsets = [3, 0, 0], sizes = [1, 8, 8], strides = [1, 1, 1]} : vector<4x8x8xf32> to vector<1x8x8xf32>
    %47 = vector.shape_cast %46 : vector<1x8x8xf32> to vector<8x8xf32>
    %48 = tpu.concatenate %41, %43, %45, %47 in 1 : vector<8x8xf32>, vector<8x8xf32>, vector<8x8xf32>, vector<8x8xf32> -> vector<8x32xf32>
    %49 = arith.truncf %48 : vector<8x32xf32> to vector<8x32xbf16>
    %c0_12 = arith.constant 0 : index
    %c0_13 = arith.constant 0 : index
    %c0_14 = arith.constant 0 : index
    %50 = vector.load %arg5[%c0_12, %c0_13, %c0_14] : memref<1x32x32xbf16, #tpu.memory_space<vmem>>, vector<1x32x32xbf16>
    %51 = vector.shape_cast %50 : vector<1x32x32xbf16> to vector<32x32xbf16>
    %cst_15 = arith.constant dense<0.000000e+00> : vector<8x32xf32>
    %52 = tpu.matmul %49, %51, %cst_15 {dimension_numbers = #tpu.dot_dimension_numbers<[1], [0], [0], [1], [0, 0, 1, 1], [], []>} : vector<8x32xbf16>, vector<32x32xbf16>, vector<8x32xf32> -> vector<8x32xf32>
    %c0_16 = arith.constant 0 : index
    %c0_17 = arith.constant 0 : index
    %c0_18 = arith.constant 0 : index
    %53 = vector.load %arg6[%c0_16, %c0_17, %c0_18] : memref<1x1x32xf32, #tpu.memory_space<vmem>>, vector<1x1x32xf32>
    %54 = vector.shape_cast %53 : vector<1x1x32xf32> to vector<1x32xf32>
    %55 = vector.broadcast %54 : vector<1x32xf32> to vector<8x32xf32>
    %56 = arith.addf %52, %55 : vector<8x32xf32>
    %57 = arith.addf %56, %3 : vector<8x32xf32>
    %58 = arith.truncf %57 : vector<8x32xf32> to vector<8x32xbf16>
    %c0_19 = arith.constant 0 : index
    %c0_20 = arith.constant 0 : index
    %c0_21 = arith.constant 0 : index
    %59 = vector.load %arg7[%c0_19, %c0_20, %c0_21] : memref<1x32x32xbf16, #tpu.memory_space<vmem>>, vector<1x32x32xbf16>
    %60 = vector.shape_cast %59 : vector<1x32x32xbf16> to vector<32x32xbf16>
    %cst_22 = arith.constant dense<0.000000e+00> : vector<8x32xf32>
    %61 = tpu.matmul %58, %60, %cst_22 {dimension_numbers = #tpu.dot_dimension_numbers<[1], [0], [0], [1], [0, 0, 1, 1], [], []>} : vector<8x32xbf16>, vector<32x32xbf16>, vector<8x32xf32> -> vector<8x32xf32>
    %c0_23 = arith.constant 0 : index
    %c0_24 = arith.constant 0 : index
    %c0_25 = arith.constant 0 : index
    %62 = vector.load %arg8[%c0_23, %c0_24, %c0_25] : memref<1x1x32xf32, #tpu.memory_space<vmem>>, vector<1x1x32xf32>
    %63 = vector.shape_cast %62 : vector<1x1x32xf32> to vector<1x32xf32>
    %64 = vector.broadcast %63 : vector<1x32xf32> to vector<8x32xf32>
    %65 = arith.addf %61, %64 : vector<8x32xf32>
    %66 = arith.addf %65, %57 : vector<8x32xf32>
    %c0_26 = arith.constant 0 : index
    %c0_27 = arith.constant 0 : index
    %67 = vector.load %arg10[%c0_26, %c0_27] : memref<8x32xf32, #tpu.memory_space<vmem>>, vector<8x32xf32>
    tpu.vector_store %arg10[%c0_26, %c0_27], %66 {strides = array<i32>} : memref<8x32xf32, #tpu.memory_space<vmem>>, vector<8x32xf32>,
    %c1_i32 = arith.constant 1 : i32
    %68 = arith.cmpi eq, %arg1, %c1_i32 : i32
    %69 = arith.extui %68 : i1 to i32
    %c0_i32_28 = arith.constant 0 : i32
    %70 = arith.cmpi ne, %69, %c0_i32_28 : i32
    scf.if %70 {
      %71 = vector.shape_cast %66 : vector<8x32xf32> to vector<1x8x32xf32>
      %c0_29 = arith.constant 0 : index
      %c0_30 = arith.constant 0 : index
      %c0_31 = arith.constant 0 : index
      %72 = vector.load %arg9[%c0_29, %c0_30, %c0_31] : memref<1x8x32xf32, #tpu.memory_space<vmem>>, vector<1x8x32xf32>
      tpu.vector_store %arg9[%c0_29, %c0_30, %c0_31], %71 {strides = array<i32>} : memref<1x8x32xf32, #tpu.memory_space<vmem>>, vector<1x8x32xf32>,
    } else {
    }
    return
  }
  func.func @transform_0(%arg0: i32, %arg1: i32) -> (i32, i32, i32) {
    %c0_i32 = arith.constant 0 : i32
    %c0_i32_0 = arith.constant 0 : i32
    %c0_i32_1 = arith.constant 0 : i32
    return %arg0, %c0_i32, %c0_i32_0 : i32, i32, i32
  }
  func.func @transform_1(%arg0: i32, %arg1: i32) -> (i32, i32, i32) {
    %c0_i32 = arith.constant 0 : i32
    %c0_i32_0 = arith.constant 0 : i32
    %c0_i32_1 = arith.constant 0 : i32
    return %arg1, %c0_i32, %c0_i32_0 : i32, i32, i32
  }
  func.func @transform_2(%arg0: i32, %arg1: i32) -> (i32, i32, i32) {
    %c0_i32 = arith.constant 0 : i32
    %c0_i32_0 = arith.constant 0 : i32
    %c0_i32_1 = arith.constant 0 : i32
    return %arg1, %c0_i32, %c0_i32_0 : i32, i32, i32
  }
  func.func @transform_3(%arg0: i32, %arg1: i32) -> (i32, i32, i32) {
    %c0_i32 = arith.constant 0 : i32
    %c0_i32_0 = arith.constant 0 : i32
    %c0_i32_1 = arith.constant 0 : i32
    return %arg1, %c0_i32, %c0_i32_0 : i32, i32, i32
  }
  func.func @transform_4(%arg0: i32, %arg1: i32) -> (i32, i32, i32) {
    %c0_i32 = arith.constant 0 : i32
    %c0_i32_0 = arith.constant 0 : i32
    %c0_i32_1 = arith.constant 0 : i32
    return %arg1, %c0_i32, %c0_i32_0 : i32, i32, i32
  }
  func.func @transform_5(%arg0: i32, %arg1: i32) -> (i32, i32, i32) {
    %c0_i32 = arith.constant 0 : i32
    %c0_i32_0 = arith.constant 0 : i32
    %c0_i32_1 = arith.constant 0 : i32
    return %arg1, %c0_i32, %c0_i32_0 : i32, i32, i32
  }
  func.func @transform_6(%arg0: i32, %arg1: i32) -> (i32, i32, i32) {
    %c0_i32 = arith.constant 0 : i32
    %c0_i32_0 = arith.constant 0 : i32
    %c0_i32_1 = arith.constant 0 : i32
    return %arg1, %c0_i32, %c0_i32_0 : i32, i32, i32
  }
  func.func @transform_7(%arg0: i32, %arg1: i32) -> (i32, i32, i32) {
    %c0_i32 = arith.constant 0 : i32
    %c0_i32_0 = arith.constant 0 : i32
    %c0_i32_1 = arith.constant 0 : i32
    return %arg0, %c0_i32, %c0_i32_0 : i32, i32, i32
  }
}

</mosaic_0001>

<bundles_post_ra>
// kernel: tpu_custom_call.1
= control target key start
LH: loop header
LB: loop body
LE: loop exit
PB: predicated region body
PF: predicated region fallthrough
CT: control target
= control target key end

     0   :  { %s2470_s0 = inlined_call_operand.hbm [shape: bf16[2,8,32], index: 0, kind: input, shape index: {}]   ;;  %s2471_s1 = inlined_call_operand.hbm [shape: bf16[2,32,96], index: 1, kind: input, shape index: {}]   ;;  %s2472_s2 = inlined_call_operand.vmem [shape: f32[2,1,96], index: 2, kind: input, shape index: {}]   ;;  %s2473_s3 = inlined_call_operand.hbm [shape: bf16[2,32,32], index: 3, kind: input, shape index: {}]   ;;  %s2474_s4 = inlined_call_operand.vmem [shape: f32[2,1,32], index: 4, kind: input, shape index: {}]   ;;  %s2475_s5 = inlined_call_operand.hbm [shape: bf16[2,32,32], index: 5, kind: input, shape index: {}]   ;;  %s2476_s6 = inlined_call_operand.vmem [shape: f32[2,1,32], index: 6, kind: input, shape index: {}]   ;;  %s2477_s7 = inlined_call_operand.hbm [shape: f32[2,8,32], index: 7, kind: output, shape index: {}]  }
   0x1   :  { %2501 = sst [smem:[#allocation27_spill]] %s2471_s1 }
   0x2   :  { %2502 = sst [smem:[#allocation28_spill]] %s2472_s2 }
   0x3   :  { %2503 = sst [smem:[#allocation29_spill]] %s2474_s4 }
   0x4   :  { %2504 = sst [smem:[#allocation30_spill]] %s2476_s6 }
   0x5   :  { %2505 = sst [smem:[#allocation31_spill]] %s2477_s7 }
   0x6   :  { %12 = vsyncpa [#allocation4], 0 }
   0x7   :  { %14 = vsyncpa [#allocation4 + $0x1], 0 }
   0x8   :  { %15 = vsyncpa [#allocation7], 0 }
   0x9   :  { %17 = vsyncpa [#allocation7 + $0x1], 0 }
   0xa   :  { %18 = vsyncpa [#allocation10], 0 }
   0xb   :  { %20 = vsyncpa [#allocation10 + $0x1], 0 }
   0xc   :  { %21 = vsyncpa [#allocation5], 0 }
   0xd   :  { %23 = vsyncpa [#allocation5 + $0x1], 0  ;;  %s1949_s24 = smov 0   ;;  %s1951_s25 = smov 0  }
   0xe   :  { %s1953_s26 = smov 0   ;;  %s1955_s27 = smov 0  }
   0xf   :  { %s1957_s28 = smov 0   ;;  %s1959_s29 = smov 0  }
  0x10   :  { %s1961_s30 = smov 0   ;;  %s1963_s8 = smov 0  }
  0x11   :  { %s1965_s9 = smov 0   ;;  %s1967_s10 = smov 0  }
  0x12   :  { %s1969_s11 = smov 0  }
  0x13 LB: > { %2506 = sst [smem:[#allocation16_spill]] %s1870_s29  ;;  %s38_s12 = sadd.s32 1, %s1882_s9  ;;  %s1890_s11 = sphi %s1969_s11, %s29_s11   ;;  %s1886_s10 = sphi %s1967_s10, %s2558_s10   ;;  %s1882_s9 = sphi %s1965_s9, %s2564_s9   ;;  %s1878_s8 = sphi %s1963_s8, %s2556_s8   ;;  %s1874_s30 = sphi %s1961_s30, %s2555_s30   ;;  %s1870_s29 = sphi %s1959_s29, %s2554_s29   ;;  %s1866_s28 = sphi %s1957_s28, %s2563_s28   ;;  %s1862_s27 = sphi %s1955_s27, %s2562_s27   ;;  %s1858_s26 = sphi %s1953_s26, %s2561_s26   ;;  %s1854_s25 = sphi %s1951_s25, %s2560_s25   ;;  %s1850_s24 = sphi %s1949_s24, %s2559_s24  }
  0x14   : > { %2507 = sst [smem:[#allocation17_spill]] %s1874_s30  ;;  %p2483_p0 = scmp.eq.s32.totalorder %s1890_s11, 0 }
  0x15   : > { %2508 = sst [smem:[#allocation18_spill]] %s1878_s8  ;;  %p2006_p1 = scmp.ge.s32.totalorder %s38_s12, 2 }
  0x16   : > { %2509 = sst [smem:[#allocation19_spill]] %s1882_s9  ;;  %s74_s14 = sadd.s32 1, %s1858_s26 }
  0x17   : > { %2510 = sst [smem:[#allocation20_spill]] %s1886_s10  ;;  %p81_p2 = scmp.ne.s32.totalorder %s1858_s26, %s1854_s25 }
  0x18   : > { %s2511_s13 = scalar_select %p2006_p1, 1, 0 }
  0x19   : > { %s2566_s12 = smov (%p2006_p1, %s38_s12), 0  ;;  %p83_p3 = por %p81_p2, %p2483_p0 }
  0x1a   : > { %2512 = sst [smem:[#allocation21_spill]] %s2566_s12  ;;  %p2482_p4 = scmp.lt.s32.totalorder %s1890_s11, 4 }
  0x1b   : > { %s71_s15 = ssub.s32 %s1882_s9, %s2566_s12  ;;  %s285_s16 = sand.u32 1, %s1890_s11  }
  0x1c   : > { %p72_p5 = scmp.eq.s32.totalorder %s71_s15, 0  ;;  %s2479_s17 = sand.u32 1, %s1858_s26  }
  0x1d   : > { %s2025_s18 = sshll.u32 %s1882_s9, 8  ;;  %s2032_s20 = sshll.u32 %s2479_s17, 4 }
  0x1e   : > { %s2028_s19 = scalar_select %p72_p5, %s1858_s26, %s74_s14  }
  0x1f   : > { %s2514_s1 = sld [smem:[#allocation27_spill]]  ;;  %p2042_p6 = pnand %p2482_p4, %p83_p3 }
  0x20   : > { %2513 = sst [smem:[#allocation22_spill]] %s2028_s19  ;;  %s289_s14 = scalar_lea.vmem [#allocation6], %s2032_s20 }
  0x21   : > { %s2515_s15 = scalar_select %p2042_p6, 1, 0 }
  0x22   : > { %s296_s12 = sshll.u32 %s289_s14, 4  ;;  %s2050_s17 = scalar_lea.sflag [#allocation7], %s285_s16  ;;  %s2047_s12 = int_to_ptr.vmem [resolvable:$true] %s296_s12 }
  0x23   : > { %p2056_p9 = pneg %p2042_p6 }
  0x25   : > { %s2038_s23 = scalar_lea.hbm %s2514_s1, %s2025_s18  ;;  %s1645_s14 = scalar_lea.hbm %s2514_s1, 512 }
  0x26   : > { %s1640_s21 = scalar_lea.hbm %s2038_s23, 256  ;;  %p1646_p12 = scmp.lt.u32.totalorder %s2038_s23, %s2514_s1 }
  0x27   : > { %p1641_p8 = scmp.ne.s32.totalorder %s2038_s23, %s1640_s21  ;;  %p1647_p13 = scmp.lt.u32.totalorder %s1645_s14, %s1640_s21 }
  0x28   : > { %p1649_p3 = scmp.lt.u32.totalorder %s1640_s21, %s2038_s23 }
  0x29   : > { %p1643_p10 = pnand %p2056_p9, %p1641_p8  ;;  %p1648_p2 = por %p1647_p13, %p1646_p12 }
  0x2b   : > { %p1644_p11 = pneg %p1643_p10  ;;  %p1650_p5 = por %p1649_p3, %p1648_p2 }
  0x2d   : > { %p1651_p4 = pnand %p1650_p5, %p1644_p11 }
  0x2f   : > { %1654 = shalt.err (!%p1651_p4)
}
  0x30   : > { %s1655_s16 = scalar_lea.vmem %s2047_s12, 256  ;;  %s1892_s9 = smov [#allocation6]  }
  0x31   : > { %p1656_p8 = scmp.ne.s32.totalorder %s2047_s12, %s1655_s16  ;;  %s1660_s19 = sshll.u32 %s1892_s9, 4  ;;  %s1661_s19 = int_to_ptr.vmem [resolvable:$false] %s1660_s19 }
  0x32   : > { %s1662_s7 = scalar_lea.vmem %s1661_s19, 512  ;;  %p1663_p7 = scmp.lt.s32.totalorder %s2047_s12, %s1661_s19 }
  0x33   : > { %p1658_p10 = pnand %p1656_p8, %p2056_p9  ;;  %p1664_p1 = scmp.lt.s32.totalorder %s1662_s7, %s1655_s16 }
  0x35   : > { %p1659_p0 = pneg %p1658_p10  ;;  %p1665_p12 = por %p1664_p1, %p1663_p7 }
  0x37   : > { %p1666_p13 = pnand %p1665_p12, %p1659_p0 }
  0x39   : > { %1669 = shalt.err (!%p1666_p13)
}
  0x3a   : > { %s2485_s8 = smov 64   ;;  %s2487_s21 = smov 4  }
  0x3b   : > { %1505 = dma.hbm_to_vmem [thread:$0]  (!%p2042_p6), %s2038_s23, 256, %s2047_s12, %s2050_s17, %s2485_s8, %s2485_s8, %s2487_s21  }
  0x3c   : > { %p364_p0 = scmp.lt.s32.totalorder %s1890_s11, 5  ;;  %p2517_p1 = scmp.ge.s32.totalorder %s1890_s11, 1 }
  0x3d   : > { %s2091_s16 = sadd.s32 4294967295, %s1890_s11   ;;  %s1343_s9 = sadd.s32 4294967294, %s1890_s11  }
  0x3e   : > { %p2086_p4 = pnand %p2517_p1, %p364_p0  ;;  %s41_s19 = sadd.s32 1, %s1886_s10 }
  0x3f   : > { %s48_s7 = sadd.s32 1, %s1870_s29  ;;  %p2519_p7 = scmp.ne.s32.totalorder %s2511_s13, 0 }
  0x40   : > { %s2518_s14 = scalar_select %p2086_p4, 1, 0 }
  0x41   : > { %s2568_s19 = smov (!%p2519_p7, %s41_s19), %s1886_s10  ;;  %p55_p11 = scmp.ne.s32.totalorder %s1870_s29, %s1866_s28 }
  0x42   : > { %p61_p2 = scmp.ne.s32.totalorder %s1866_s28, %s1862_s27  ;;  %p43_p3 = scmp.ge.s32.totalorder %s2568_s19, 2 }
  0x43   : > { %p62_p5 = scmp.eq.s32.totalorder %s2091_s16, 0  ;;  %p2520_p8 = scmp.eq.s32.totalorder %s1890_s11, 0 }
  0x44   : > { %p87_p12 = scmp.ne.s32.totalorder %s1854_s25, %s1850_s24  ;;  %s2570_s19 = smov (%p43_p3, %s2568_s19), 0 }
  0x45   : > { %p2109_p10 = por %p2520_p8, %p55_p11  ;;  %2522 = sst [smem:[#allocation23_spill]] %s2570_s19 }
  0x46   : > { %p2120_p13 = por %p62_p5, %p61_p2  ;;  %p2124_p0 = por %p87_p12, %p62_p5 }
  0x47   : > { %s45_s8 = ssub.s32 %s1886_s10, %s2570_s19  ;;  %p241_p1 = scmp.eq.s32.totalorder %s2091_s16, 3 }
  0x48   : > { %s2523_s13 = scalar_select %p2120_p13, 1, 0 }
  0x49   : > { %s2524_s23 = scalar_select %p2124_p0, 1, 0 }
  0x4a   : > { %p46_p7 = scmp.eq.s32.totalorder %s45_s8, 0  ;;  %p247_p8 = scmp.eq.s32.totalorder %s1343_s9, 3 }
  0x4b   : > { %p2134_p3 = por %p241_p1, %p55_p11  ;;  %s267_s21 = sand.u32 1, %s1870_s29  }
  0x4c   : > { %s2140_s1 = scalar_select %p46_p7, %s1870_s29, %s48_s7  }
  0x4d   : > { %s2525_s24 = scalar_select %p2134_p3, 1, 0 }
  0x4e   : > { %2527 = sst [smem:[#allocation25_spill]] %s2140_s1  ;;  %p2145_p4 = por %p247_p8, %p61_p2 }
  0x4f   : > { %2526 = sst [smem:[#allocation24_spill]] %s2525_s24  ;;  %s1346_s4 = sshll.u32 %s267_s21, 2 }
  0x50   : > { %s2528_s6 = scalar_select %p2145_p4, 1, 0 }
  0x51   : > { %s1347_s2 = sshll.u32 %s1886_s10, 6  ;;  %s271_s9 = scalar_lea.vmem [#allocation3], %s1346_s4 }
  0x52   : > { %2529 = sst [smem:[#allocation26_spill]] %s2528_s6  ;;  %s2153_s8 = scalar_lea.hbm %s2470_s0, %s1347_s2 }
  0x53   : > { %s278_s24 = sshll.u32 %s271_s9, 4  ;;  %p2530_p11 = scmp.lt.s32.totalorder %s1890_s11, 4  ;;  %s2163_s24 = int_to_ptr.vmem [resolvable:$true] %s278_s24 }
  0x54   : > { %s2169_s2 = scalar_lea.hbm %s2473_s3, %s2025_s18  ;;  %s268_s19 = scalar_lea.sflag [#allocation4], %s267_s21 }
  0x55   : > { %p2159_p5 = pnand %p2530_p11, %p2109_p10  ;;  %s1670_s1 = scalar_lea.hbm %s2153_s8, 64 }
  0x56   : > { %p1671_p2 = scmp.ne.s32.totalorder %s2153_s8, %s1670_s1  ;;  %s1675_s9 = scalar_lea.hbm %s2470_s0, 128 }
  0x57   : > { %p1672_p12 = pneg %p2159_p5  ;;  %p1676_p7 = scmp.lt.u32.totalorder %s2153_s8, %s2470_s0 }
  0x58   : > { %p1677_p8 = scmp.lt.u32.totalorder %s1675_s9, %s1670_s1  ;;  %p1679_p4 = scmp.lt.u32.totalorder %s1670_s1, %s2153_s8 }
  0x59   : > { %p1673_p10 = pnand %p1672_p12, %p1671_p2 }
  0x5a   : > { %p1678_p11 = por %p1677_p8, %p1676_p7 }
  0x5b   : > { %p1674_p1 = pneg %p1673_p10 }
  0x5c   : > { %p1680_p3 = por %p1679_p4, %p1678_p11 }
  0x5e   : > { %p1681_p0 = pnand %p1680_p3, %p1674_p1 }
  0x60   : > { %1684 = shalt.err (!%p1681_p0)
}
  0x61   : > { %s1685_s10 = scalar_lea.vmem %s2163_s24, 64  ;;  %s1895_s21 = smov [#allocation3]  }
  0x62   : > { %p1686_p2 = scmp.ne.s32.totalorder %s2163_s24, %s1685_s10  ;;  %s1690_s30 = sshll.u32 %s1895_s21, 4  ;;  %s1691_s30 = int_to_ptr.vmem [resolvable:$false] %s1690_s30 }
  0x63   : > { %s1692_s6 = scalar_lea.vmem %s1691_s30, 128  ;;  %p1693_p6 = scmp.lt.s32.totalorder %s2163_s24, %s1691_s30 }
  0x64   : > { %p1688_p10 = pnand %p1686_p2, %p1672_p12  ;;  %p1694_p7 = scmp.lt.s32.totalorder %s1692_s6, %s1685_s10 }
  0x66   : > { %p1689_p13 = pneg %p1688_p10  ;;  %p1695_p8 = por %p1694_p7, %p1693_p6 }
  0x68   : > { %p1696_p4 = pnand %p1695_p8, %p1689_p13 }
  0x6a   : > { %1699 = shalt.err (!%p1696_p4)
}
  0x6b   : > { %1502 = dma.hbm_to_vmem [thread:$0]  (!%p2159_p5), %s2153_s8, 64, %s2163_s24, %s268_s19  }
  0x6c   : > { %s316_s1 = scalar_lea.vmem [#allocation8], %s2032_s20  ;;  %s1700_s4 = scalar_lea.hbm %s2169_s2, 256 }
  0x6d   : > { %s323_s29 = sshll.u32 %s316_s1, 4  ;;  %p1701_p0 = scmp.ne.s32.totalorder %s2169_s2, %s1700_s4  ;;  %s2197_s29 = int_to_ptr.vmem [resolvable:$true] %s323_s29 }
  0x6e   : > { %s1705_s9 = scalar_lea.hbm %s2473_s3, 512  ;;  %p1706_p3 = scmp.lt.u32.totalorder %s2169_s2, %s2473_s3 }
  0x6f   : > { %p1703_p6 = pnand %p1701_p0, %p2056_p9  ;;  %p1707_p12 = scmp.lt.u32.totalorder %s1705_s9, %s1700_s4 }
  0x70   : > { %p1709_p5 = scmp.lt.u32.totalorder %s1700_s4, %s2169_s2 }
  0x71   : > { %p1704_p13 = pneg %p1703_p6  ;;  %p1708_p1 = por %p1707_p12, %p1706_p3 }
  0x73   : > { %p1710_p11 = por %p1709_p5, %p1708_p1 }
  0x75   : > { %p1711_p2 = pnand %p1710_p11, %p1704_p13 }
  0x77   : > { %1714 = shalt.err (!%p1711_p2)
}
  0x78   : > { %s1715_s24 = scalar_lea.vmem %s2197_s29, 256  ;;  %s1896_s8 = smov [#allocation8]  }
  0x79   : > { %p1716_p10 = scmp.ne.s32.totalorder %s2197_s29, %s1715_s24  ;;  %s1720_s19 = sshll.u32 %s1896_s8, 4  ;;  %s1721_s19 = int_to_ptr.vmem [resolvable:$false] %s1720_s19 }
  0x7a   : > { %s1722_s30 = scalar_lea.vmem %s1721_s19, 512  ;;  %p1723_p4 = scmp.lt.s32.totalorder %s2197_s29, %s1721_s19 }
  0x7b   : > { %p1718_p7 = pnand %p1716_p10, %p2056_p9  ;;  %p1724_p0 = scmp.lt.s32.totalorder %s1722_s30, %s1715_s24 }
  0x7d   : > { %p1719_p8 = pneg %p1718_p7  ;;  %p1725_p6 = por %p1724_p0, %p1723_p4 }
  0x7f   : > { %p1726_p3 = pnand %p1725_p6, %p1719_p8 }
  0x81   : > { %1729 = shalt.err (!%p1726_p3)
}
  0x82   : > { %p2532_p13 = scmp.ne.s32.totalorder %s2515_s15, 0  ;;  %s2533_s6 = smov 4  }
  0x83   : > { %s2534_s1 = smov 64   ;;  %s2228_s7 = scalar_lea.hbm %s2475_s5, %s2025_s18 }
  0x84   : > { %1508 = dma.hbm_to_vmem [thread:$0]  (!%p2532_p13), %s2169_s2, 256, %s2197_s29, %s2050_s17, %s2534_s1, %s2534_s1, %s2533_s6  }
  0x85   : > { %s343_s9 = scalar_lea.vmem [#allocation9], %s2032_s20  ;;  %s2535_s21 = sand.u32 1, %s1858_s26  }
  0x86   : > { %s350_s10 = sshll.u32 %s343_s9, 4  ;;  %s2235_s24 = scalar_lea.sflag [#allocation10], %s2535_s21  ;;  %s2231_s10 = int_to_ptr.vmem [resolvable:$true] %s350_s10 }
  0x87   : > { %s1730_s8 = scalar_lea.hbm %s2228_s7, 256  ;;  %s1735_s18 = scalar_lea.hbm %s2475_s5, 512 }
  0x88   : > { %p1731_p12 = scmp.ne.s32.totalorder %s2228_s7, %s1730_s8  ;;  %p1736_p11 = scmp.lt.u32.totalorder %s2228_s7, %s2475_s5 }
  0x89   : > { %p1737_p2 = scmp.lt.u32.totalorder %s1735_s18, %s1730_s8  ;;  %p1739_p7 = scmp.lt.u32.totalorder %s1730_s8, %s2228_s7 }
  0x8a   : > { %p1733_p1 = pnand %p1731_p12, %p2056_p9 }
  0x8b   : > { %p1738_p10 = por %p1737_p2, %p1736_p11 }
  0x8c   : > { %p1734_p5 = pneg %p1733_p1 }
  0x8d   : > { %p1740_p8 = por %p1739_p7, %p1738_p10 }
  0x8f   : > { %p1741_p4 = pnand %p1740_p8, %p1734_p5 }
  0x91   : > { %1744 = shalt.err (!%p1741_p4)
}
  0x92   : > { %s1745_s20 = scalar_lea.vmem %s2231_s10, 256  ;;  %s1897_s30 = smov [#allocation9]  }
  0x93   : > { %p1746_p0 = scmp.ne.s32.totalorder %s2231_s10, %s1745_s20  ;;  %s1750_s4 = sshll.u32 %s1897_s30, 4  ;;  %s1751_s4 = int_to_ptr.vmem [resolvable:$false] %s1750_s4 }
  0x94   : > { %s1752_s12 = scalar_lea.vmem %s1751_s4, 512  ;;  %p1753_p12 = scmp.lt.s32.totalorder %s2231_s10, %s1751_s4 }
  0x95   : > { %p1748_p6 = pnand %p1746_p0, %p2056_p9  ;;  %p1754_p1 = scmp.lt.s32.totalorder %s1752_s12, %s1745_s20 }
  0x97   : > { %p1749_p3 = pneg %p1748_p6  ;;  %p1755_p11 = por %p1754_p1, %p1753_p12 }
  0x99   : > { %p1756_p2 = pnand %p1755_p11, %p1749_p3 }
  0x9b   : > { %1759 = shalt.err (!%p1756_p2)
}
  0x9c   : > { %1511 = dma.hbm_to_vmem [thread:$0]  (!%p2532_p13), %s2228_s7, 256, %s2231_s10, %s2235_s24, %s2534_s1, %s2534_s1, %s2533_s6  }
  0x9d   : > { %p2536_p9 = scmp.ne.s32.totalorder %s2518_s14, 0 }
  0x9e   : > { %s2265_s22 = sand.u32 (!%p2536_p9), 1, %s1866_s28   ;;  %p2537_p5 = scmp.ne.s32.totalorder (!%p2536_p9), %s2523_s13, 0 }
  0x9f   : > { %368 = sbr.rel (%p2536_p9) target bundleno = 1828 (0x724), region = 48  ;;  %s1358_s9 = sshll.u32 (!%p2536_p9), %s2265_s22, 2 }
  0xa0   : > { %s371_s21 = scalar_lea.sflag (!%p2536_p9), [#allocation4], %s2265_s22  ;;  %s374_s8 = scalar_lea.vmem (!%p2536_p9), [#allocation3], %s1358_s9 }
  0xa6   : > { %1833 = dma.done.wait (%p2537_p5), %s371_s21, 64  }
  0xa7   : > { %1835 = vsyncadd (%p2537_p5), %s371_s21, 4294967232  ;;  %s379_s15 = sand.u32 1, %s2091_s16   ;;  %s381_s14 = sand.u32 1, %s1854_s25  }
  0xa8   : > { %s2275_s6 = sshll.u32 %s381_s14, 4  ;;  %s380_s1 = scalar_lea.sflag [#allocation7], %s379_s15 }
  0xa9   : > { %s383_s7 = scalar_lea.vmem [#allocation6], %s2275_s6  ;;  %p2538_p13 = scmp.ne.s32.totalorder %s2524_s23, 0 }
  0xab   : > { %1837 = dma.done.wait (%p2538_p13), %s380_s1, 512  }
  0xac   : > { %1839 = vsyncadd (%p2538_p13), %s380_s1, 4294966784  ;;  %s392_s13 = scalar_lea.vmem [#allocation8], %s2275_s6  ;;  %s398_s10 = scalar_lea.sflag [#allocation10], %s381_s14 }
  0xad   : > { %s401_s24 = scalar_lea.vmem [#allocation9], %s2275_s6 }
  0xae   : > { %1841 = dma.done.wait (%p2538_p13), %s398_s10, 256  }
  0xaf   : > { %1843 = vsyncadd (%p2538_p13), %s398_s10, 4294967040  ;;  %s2539_s16 = sld [smem:[#allocation17_spill]]  ;;  %s1362_s17 = sshll.u32 %s2265_s22, 3 }
  0xb0   : > { %s2540_s19 = sld [smem:[#allocation28_spill]]  ;;  %s2541_s12 = sld [smem:[#allocation29_spill]] }
  0xb1   : > { %s2542_s15 = sld [smem:[#allocation30_spill]]  ;;  %s2305_s1 = scalar_lea.vmem [#allocation11], %s1362_s17 }
  0xb5   : > { %p456_p10 = scmp.lt.s32.totalorder %s2539_s16, 1  ;;  %p1363_p7 = scmp.ne.s32.totalorder %s2539_s16, 0 }
  0xb6   : > { %v470_v0 = vld [vmem:[%s374_s8] sm:$0xf] (!%p1363_p7)  ;;  %vm472_vm0 = vcmask (!%p1363_p7), 261120  }
  0xb7   : > { %s2291_s2 = scalar_select %p456_p10, %s2539_s16, 1 }
  0xb8   : > { %469 = sbr.rel (%p1363_p7) target bundleno = 191 (0xbf), region = 68  ;;  %v471_v1 = vunpack.c.l.bf16 (!%p1363_p7), %v470_v0 }
  0xb9   : > { %s458_s20 = scalar_lea.vmem %s2540_s19, %s2291_s2  ;;  %s461_s9 = scalar_lea.vmem %s2541_s12, %s2291_s2 }
  0xba   : > { %s464_s14 = scalar_lea.vmem %s2542_s15, %s2291_s2  ;;  %473 = vst.msk [vmem:[#allocation2] sm:$0xff] (!%p1363_p7), %vm472_vm0, %v471_v1 }
  0xbf PF: > { %v1618_v2 = vld [vmem:[%s383_s7] sm:$0xff]   ;;  %v1898_v3 = vmov 0.0   ;;  %v1619_v4 = vld [vmem:[%s383_s7 + $0x8] sm:$0xff]   ;;  %vm1899_vm1 = vmmov 0   ;;  %vm499_vm2 = vcmask 261120   ;;  %s1900_s8 = smov 56  }
  0xc0   : > { %1417 = vmatprep.subr.bf16.mxu0 %v1898_v3  ;;  %1425 = vmatprep.subr.bf16.mxu1 %v1898_v3  ;;  %v1364_v7 = vld [vmem:[%s458_s20] ss:$0 sm:$0xff]  ;;  %s1901_s7 = smov 104   ;;  %s1902_s10 = smov 80   ;;  %vm560_vm3 = vcmask 64512   ;;  %vm803_vm4 = vcmask 1043456  }
  0xc1   : > { %1418 = vmatpush3.bf16.msra.mxu0 %v1618_v2  ;;  %1421 = vmatprep.mubr.msk.bf16.mxu0 %vm1899_vm1, %v1898_v3  ;;  %v2312_v5 = vld [vmem:[#allocation2] sm:$0xff]  ;;  %s1903_s16 = smov 120   ;;  %s1904_s17 = smov 112   ;;  %vm1008_vm5 = vcmask 130048   ;;  %vm1010_vm6 = vcmask 195584  }
  0xc2   : > { %1419 = vmatprep.subr.bf16.mxu0 %v1898_v3  ;;  %1427 = vmatprep.mubr.msk.bf16.mxu1 %vm1899_vm1, %v1898_v3  ;;  %v475_v6 = vpack.c.bf16 %v2312_v5, %v2312_v5  ;;  %s1905_s18 = smov 8   ;;  %s1906_s29 = smov 16  }
  0xc5   : > { %1420 = vmatpush3.bf16.msra.mxu0 %v1619_v4 }
  0xc6   : > { %1431 = vmatprep.subr.bf16.mxu0 %v1898_v3 }
  0xc8   : > { %1422 = vmatmul.mubr.msk.bf16.vlgmr.msra.gmra.mrb[0].mxu0 %vm499_vm2, %v475_v6 }
  0xc9   : > { %1433 = vmatprep.mubr.msk.bf16.mxu0 %vm1899_vm1, %v1898_v3 }
 0x19b   : > { %v537_v8 = vpop.f32.mrb[0].mxu0 }
 0x19c   : > { %v538_v9 = vadd.f32 %v1364_v7, %v537_v8  ;;  %v1423_v10 = vpop.f32.mrb[1].mxu0 }
 0x19d   : > { %v540_v11 = vpop.f32.mrb[2].mxu0 }
 0x19e   : > { %550 = vrot.lane.b32.xlu1 %v538_v9, %s1900_s8  ;;  %544 = vrot.lane.b32.xlu0 %v538_v9, %s1901_s7  ;;  %v1424_v12 = vpop.f32.mrb[3].mxu0  ;;  %v553_v13 = vpack.c.bf16 %v538_v9, %v538_v9 }
 0x1a2   : > { %547 = vrot.lane.b32.xlu0 %v538_v9, %s1902_s10  ;;  %558 = vrot.lane.b32.xlu1 %v553_v13, %s1903_s16 }
 0x210   : > { %v551_v14 = vpop.permute.xlu1 %550  ;;  %v545_v15 = vpop.permute.xlu0 %544 }
 0x211   : > { %v554_v16 = vpack.c.bf16 %v545_v15, %v545_v15  ;;  %v2323_v19 = vpack.c.bf16 %v551_v14, %v551_v14 }
 0x213   : > { %608 = vrot.lane.b32.xlu0 %v554_v16, %s1903_s16 }
 0x214   : > { %v548_v17 = vpop.permute.xlu0 %547  ;;  %v559_v18 = vpop.permute.xlu1 %558 }
 0x215   : > { %v555_v20 = vpack.c.bf16 %v548_v17, %v548_v17  ;;  %v565_v21 = vsel %vm560_vm3, %v559_v18, 0 }
 0x216   : > { %1426 = vmatpush3.bf16.xpose.msra.mxu1 %v565_v21 }
 0x217   : > { %706 = vrot.lane.b32.xlu0 %v2323_v19, %s1903_s16  ;;  %657 = vrot.lane.b32.xlu1 %v555_v20, %s1903_s16 }
 0x218   : > { %1437 = vmatprep.subr.bf16.mxu1 %v1898_v3 }
 0x21b   : > { %798 = vrot.lane.b32.xlu0 %v553_v13, %s1904_s17  ;;  %847 = vrot.lane.b32.xlu1 %v554_v16, %s1904_s17 }
 0x21d   : > { %1428 = vmatmul.mubr.msk.bf16.vlgmr.msra.gmra.mrb[0].mxu1 %vm560_vm3, %v553_v13 }
 0x21e   : > { %1439 = vmatprep.mubr.msk.bf16.mxu1 %vm1899_vm1, %v1898_v3 }
 0x285   : > { %v609_v22 = vpop.permute.xlu0 %608 }
 0x286   : > { %v614_v23 = vsel %vm560_vm3, %v609_v22, 0 }
 0x287   : > { %1432 = vmatpush3.bf16.xpose.msra.mxu0 %v614_v23 }
 0x288   : > { %1443 = vmatprep.subr.bf16.mxu0 %v1898_v3 }
 0x289   : > { %v707_v24 = vpop.permute.xlu0 %706  ;;  %v658_v25 = vpop.permute.xlu1 %657 }
 0x28a   : > { %v663_v26 = vsel %vm560_vm3, %v658_v25, 0  ;;  %v712_v27 = vsel %vm560_vm3, %v707_v24, 0  ;;  %v1620_v24 = vld [vmem:[%s392_s13] sm:$0xff]  }
 0x28b   : > { %1438 = vmatpush3.bf16.xpose.msra.mxu1 %v663_v26  ;;  %v1621_v26 = vld [vmem:[%s392_s13 + $0x8] sm:$0xff]   ;;  %s1907_s13 = smov 24  }
 0x28c   : > { %1449 = vmatprep.subr.bf16.mxu1 %v1898_v3 }
 0x28d   : > { %v799_v28 = vpop.permute.xlu0 %798  ;;  %v848_v30 = vpop.permute.xlu1 %847 }
 0x28e   : > { %1434 = vmatmul.mubr.msk.bf16.vlgmr.msra.gmra.mrb[4].mxu0 %vm560_vm3, %v554_v16  ;;  %v805_v29 = vsel %vm803_vm4, %v799_v28, 0  ;;  %v853_v31 = vsel %vm803_vm4, %v848_v30, 0 }
 0x28f   : > { %1444 = vmatpush3.bf16.xpose.msra.mxu0 %v712_v27  ;;  %1445 = vmatprep.mubr.msk.bf16.mxu0 %vm1899_vm1, %v1898_v3 }
 0x290   : > { %1455 = vmatprep.subr.bf16.mxu0 %v1898_v3 }
 0x292   : > { %1440 = vmatmul.mubr.msk.bf16.vlgmr.msra.gmra.mrb[4].mxu1 %vm560_vm3, %v555_v20 }
 0x293   : > { %1450 = vmatpush3.bf16.msra.mxu1 %v805_v29  ;;  %1451 = vmatprep.mubr.msk.bf16.mxu1 %vm1899_vm1, %v1898_v3 }
 0x294   : > { %1461 = vmatprep.subr.bf16.mxu1 %v1898_v3 }
 0x296   : > { %1446 = vmatmul.mubr.msk.bf16.vlgmr.msra.gmra.mrb[8].mxu0 %vm560_vm3, %v2323_v19 }
 0x297   : > { %1456 = vmatpush3.bf16.msra.mxu0 %v853_v31  ;;  %1457 = vmatprep.mubr.msk.bf16.mxu0 %vm1899_vm1, %v1898_v3 }
 0x298   : > { %1467 = vmatprep.subr.bf16.mxu0 %v1898_v3 }
 0x2f0   : > { %v601_v32 = vpop.f32.mrb[0].mxu1 }
 0x2f1   : > { %v1429_v33 = vpop.f32.mrb[1].mxu1  ;;  %v754_v34 = vsel %vm560_vm3, %v601_v32, -inf }
 0x2f2   : > { %755 = vmax.xlane.f32.xlu1 %v754_v34  ;;  %v604_v35 = vpop.f32.mrb[2].mxu1 }
 0x2f3   : > { %v1430_v36 = vpop.f32.mrb[3].mxu1 }
 0x361   : > { %v650_v37 = vpop.f32.mrb[4].mxu0 }
 0x362   : > { %v1435_v38 = vpop.f32.mrb[5].mxu0  ;;  %v757_v39 = vsel %vm560_vm3, %v650_v37, -inf }
 0x363   : > { %758 = vmax.xlane.f32.xlu0 %v757_v39  ;;  %v653_v40 = vpop.f32.mrb[6].mxu0 }
 0x364   : > { %v1436_v41 = vpop.f32.mrb[7].mxu0 }
 0x365   : > { %v699_v42 = vpop.f32.mrb[4].mxu1 }
 0x366   : > { %v1441_v43 = vpop.f32.mrb[5].mxu1  ;;  %v760_v44 = vsel %vm560_vm3, %v699_v42, -inf }
 0x367   : > { %v702_v45 = vpop.f32.mrb[6].mxu1  ;;  %761 = vmax.xlane.f32.xlu0 %v760_v44 }
 0x368   : > { %v1442_v46 = vpop.f32.mrb[7].mxu1 }
 0x369   : > { %v748_v47 = vpop.f32.mrb[8].mxu0 }
 0x36a   : > { %v1447_v48 = vpop.f32.mrb[9].mxu0  ;;  %v763_v49 = vsel %vm560_vm3, %v748_v47, -inf }
 0x36b   : > { %764 = vmax.xlane.f32.xlu1 %v763_v49  ;;  %v751_v50 = vpop.f32.mrb[10].mxu0 }
 0x36c   : > { %v1448_v51 = vpop.f32.mrb[11].mxu0 }
 0x37c   : > { %895 = vrot.lane.b32.xlu1 %v555_v20, %s1904_s17 }
 0x37d   : > { %943 = vrot.lane.b32.xlu0 %v2323_v19, %s1904_s17 }
 0x37f   : > { %v756_v52 = vpop.xlane.xlu1 %755 }
 0x380   : > { %v766_v53 = vsub.f32 %v601_v32, %v756_v52 }
 0x382   : > { %v770_v54 = vmul.f32 1.442695, %v766_v53 }
 0x384   : > { %1624 = vpow2.f32 %v770_v54 }
 0x38e   : > { %v1625_v55 = vpop.eup %1624 }
 0x38f   : > { %v794_v56 = vpack.c.bf16 %v1625_v55, %v1625_v55  ;;  %v778_v13 = vsel %vm560_vm3, %v1625_v55, 0.0  ;;  %v1622_v55 = vld [vmem:[%s401_s24] sm:$0xff]  }
 0x391   : > { %1452 = vmatmul.mubr.msk.bf16.vlgmr.msra.gmra.mrb[8].mxu1 %vm560_vm3, %v794_v56  ;;  %v1623_v56 = vld [vmem:[%s401_s24 + $0x8] sm:$0xff]   ;;  %s2545_s24 = sld [smem:[#allocation17_spill]] }
 0x392   : > { %1463 = vmatprep.mubr.msk.bf16.mxu1 %vm1899_vm1, %v1898_v3 }
 0x397   : > { %p1384_p8 = scmp.ne.s32.totalorder %s2545_s24, 1 }
 0x3f0   : > { %v759_v57 = vpop.xlane.xlu0 %758 }
 0x3f1   : > { %v767_v58 = vsub.f32 %v650_v37, %v759_v57  ;;  %v1376_v57 = vld [vmem:[%s461_s9] ss:$0 sm:$0xff] }
 0x3f3   : > { %v772_v59 = vmul.f32 1.442695, %v767_v58 }
 0x3f4   : > { %v762_v60 = vpop.xlane.xlu0 %761 }
 0x3f5   : > { %1626 = vpow2.f32 %v772_v59  ;;  %v768_v61 = vsub.f32 %v699_v42, %v762_v60 }
 0x3f7   : > { %v774_v62 = vmul.f32 1.442695, %v768_v61 }
 0x3f8   : > { %v765_v63 = vpop.xlane.xlu1 %764  ;;  %v944_v7 = vpop.permute.xlu0 %943 }
 0x3f9   : > { %1628 = vpow2.f32 %v774_v62  ;;  %v769_v0 = vsub.f32 %v748_v47, %v765_v63  ;;  %v949_v10 = vsel %vm803_vm4, %v944_v7, 0 }
 0x3fb   : > { %v776_v1 = vmul.f32 1.442695, %v769_v0 }
 0x3fc   : > { %v896_v2 = vpop.permute.xlu1 %895 }
 0x3fd   : > { %1630 = vpow2.f32 %v776_v1  ;;  %v901_v4 = vsel %vm803_vm4, %v896_v2, 0 }
 0x3fe   : > { %1462 = vmatpush3.bf16.msra.mxu1 %v901_v4 }
 0x3ff   : > { %v1627_v6 = vpop.eup %1626  ;;  %1473 = vmatprep.subr.bf16.mxu1 %v1898_v3 }
 0x400   : > { %v781_v8 = vsel %vm560_vm3, %v1627_v6, 0.0  ;;  %v795_v9 = vpack.c.bf16 %v1627_v6, %v1627_v6 }
 0x401   : > { %782 = vadd.xlane.f32.xlu1 %v781_v8 }
 0x402   : > { %1458 = vmatmul.mubr.msk.bf16.vlgmr.msra.gmra.mrb[12].mxu0 %vm560_vm3, %v795_v9 }
 0x403   : > { %v1629_v11 = vpop.eup %1628  ;;  %1468 = vmatpush3.bf16.msra.mxu0 %v949_v10  ;;  %1469 = vmatprep.mubr.msk.bf16.mxu0 %vm1899_vm1, %v1898_v3 }
 0x404   : > { %v784_v12 = vsel %vm560_vm3, %v1629_v11, 0.0  ;;  %v796_v14 = vpack.c.bf16 %v1629_v11, %v1629_v11  ;;  %1481 = vmatprep.subr.bf16.mxu0 %v1898_v3 }
 0x405   : > { %785 = vadd.xlane.f32.xlu0 %v784_v12  ;;  %779 = vadd.xlane.f32.xlu1 %v778_v13 }
 0x406   : > { %1464 = vmatmul.mubr.msk.bf16.vlgmr.msra.gmra.mrb[12].mxu1 %vm560_vm3, %v796_v14 }
 0x407   : > { %v1631_v15 = vpop.eup %1630  ;;  %1477 = vmatprep.mubr.msk.bf16.mxu1 %vm1899_vm1, %v1898_v3  ;;  %1474 = vmatpush3.bf16.msra.mxu1 %v1620_v24 }
 0x408   : > { %v787_v16 = vsel %vm560_vm3, %v1631_v15, 0.0  ;;  %v797_v17 = vpack.c.bf16 %v1631_v15, %v1631_v15  ;;  %1475 = vmatprep.subr.bf16.mxu1 %v1898_v3 }
 0x409   : > { %788 = vadd.xlane.f32.xlu0 %v787_v16 }
 0x40a   : > { %1470 = vmatmul.mubr.msk.bf16.vlgmr.msra.gmra.mrb[16].mxu0 %vm560_vm3, %v797_v17 }
 0x40b   : > { %1485 = vmatprep.mubr.msk.bf16.mxu0 %vm1899_vm1, %v1898_v3  ;;  %1476 = vmatpush3.bf16.msra.mxu1 %v1621_v26 }
 0x40c   : > { %1482 = vmatpush3.bf16.msra.mxu0 %v1622_v55 }
 0x40d   : > { %1483 = vmatprep.subr.bf16.mxu0 %v1898_v3  ;;  %v1380_v3 = vld [vmem:[%s464_s14] ss:$0 sm:$0xff] }
 0x410   : > { %1484 = vmatpush3.bf16.msra.mxu0 %v1623_v56 }
 0x464   : > { %v841_v18 = vpop.f32.mrb[8].mxu1 }
 0x465   : > { %v1453_v19 = vpop.f32.mrb[9].mxu1 }
 0x466   : > { %v844_v20 = vpop.f32.mrb[10].mxu1 }
 0x467   : > { %v1454_v21 = vpop.f32.mrb[11].mxu1 }
 0x48e   : > { %v783_v22 = vpop.xlane.xlu1 %782 }
 0x48f   : > { %1632 = vrcp.f32 %v783_v22 }
 0x492   : > { %v786_v23 = vpop.xlane.xlu0 %785  ;;  %v780_v45 = vpop.xlane.xlu1 %779 }
 0x493   : > { %1634 = vrcp.f32 %v786_v23 }
 0x496   : > { %v789_v25 = vpop.xlane.xlu0 %788 }
 0x497   : > { %1636 = vrcp.f32 %v789_v25 }
 0x498   : > { %1638 = vrcp.f32 %v780_v45 }
 0x499   : > { %v1633_v27 = vpop.eup %1632 }
 0x49d   : > { %v1635_v33 = vpop.eup %1634 }
 0x4a1   : > { %v1637_v39 = vpop.eup %1636 }
 0x4a2   : > { %v1639_v46 = vpop.eup %1638 }
 0x4a3   : > { %v991_v49 = vmul.f32 %v1639_v46, %v841_v18 }
 0x4d5   : > { %v889_v28 = vpop.f32.mrb[12].mxu0 }
 0x4d6   : > { %v992_v29 = vmul.f32 %v1633_v27, %v889_v28  ;;  %v1459_v30 = vpop.f32.mrb[13].mxu0 }
 0x4d7   : > { %v892_v31 = vpop.f32.mrb[14].mxu0 }
 0x4d8   : > { %996 = vrot.lane.b32.xlu0 %v992_v29, %s1905_s18  ;;  %v1460_v32 = vpop.f32.mrb[15].mxu0 }
 0x4d9   : > { %v937_v34 = vpop.f32.mrb[12].mxu1 }
 0x4da   : > { %v993_v35 = vmul.f32 %v1635_v33, %v937_v34  ;;  %v1465_v36 = vpop.f32.mrb[13].mxu1 }
 0x4db   : > { %v940_v37 = vpop.f32.mrb[14].mxu1 }
 0x4dc   : > { %1000 = vrot.lane.b32.xlu1 %v993_v35, %s1906_s29  ;;  %v1466_v38 = vpop.f32.mrb[15].mxu1 }
 0x4dd   : > { %v985_v40 = vpop.f32.mrb[16].mxu0 }
 0x4de   : > { %v994_v41 = vmul.f32 %v1637_v39, %v985_v40  ;;  %v1471_v42 = vpop.f32.mrb[17].mxu0 }
 0x4df   : > { %v988_v43 = vpop.f32.mrb[18].mxu0 }
 0x4e0   : > { %1004 = vrot.lane.b32.xlu1 %v994_v41, %s1907_s13  ;;  %v1472_v44 = vpop.f32.mrb[19].mxu0 }
 0x54a   : > { %v997_v47 = vpop.permute.xlu0 %996 }
 0x54b   : > { %v1007_v50 = vsel %vm560_vm3, %v991_v49, %v997_v47 }
 0x54e   : > { %v1001_v48 = vpop.permute.xlu1 %1000 }
 0x54f   : > { %v1009_v51 = vsel %vm1008_vm5, %v1007_v50, %v1001_v48 }
 0x552   : > { %v1005_v52 = vpop.permute.xlu1 %1004 }
 0x553   : > { %v1011_v53 = vsel %vm1010_vm6, %v1009_v51, %v1005_v52 }
 0x554   : > { %v1012_v54 = vpack.c.bf16 %v1011_v53, %v1011_v53 }
 0x556   : > { %1478 = vmatmul.mubr.msk.bf16.vlgmr.msra.gmra.mrb[16].mxu1 %vm499_vm2, %v1012_v54 }
 0x629   : > { %v1073_v58 = vpop.f32.mrb[16].mxu1 }
 0x62a   : > { %v1074_v59 = vadd.f32 %v1376_v57, %v1073_v58  ;;  %v1479_v60 = vpop.f32.mrb[17].mxu1 }
 0x62b   : > { %v1076_v61 = vpop.f32.mrb[18].mxu1 }
 0x62c   : > { %v1079_v62 = vadd.f32 %v1074_v59, %v2312_v5  ;;  %v1480_v63 = vpop.f32.mrb[19].mxu1 }
 0x62e   : > { %v1080_v0 = vpack.c.bf16 %v1079_v62, %v1079_v62 }
 0x630   : > { %1486 = vmatmul.mubr.msk.bf16.vlgmr.msra.gmra.mrb[20].mxu0 %vm499_vm2, %v1080_v0 }
 0x702   : > { %1152 = sbr.rel (%p1384_p8) target bundleno = 1801 (0x709), region = 72 }
 0x703   : > { %v1141_v1 = vpop.f32.mrb[20].mxu0 }
 0x704   : > { %v1142_v2 = vadd.f32 %v1380_v3, %v1141_v1  ;;  %v1487_v4 = vpop.f32.mrb[21].mxu0 }
 0x705   : > { %v1144_v6 = vpop.f32.mrb[22].mxu0 }
 0x706   : > { %v1147_v7 = vadd.f32 %v1142_v2, %v1079_v62  ;;  %v1488_v8 = vpop.f32.mrb[23].mxu0 }
 0x708   : > { %1148 = vst.msk [vmem:[#allocation2] sm:$0xff] %vm499_vm2, %v1147_v7  ;;  %1153 = vst.msk [vmem:[%s2305_s1] sm:$0xff] (!%p1384_p8), %vm499_vm2, %v1147_v7 }
 0x709 PF: > { %s2546_s9 = sld [smem:[#allocation18_spill]]  ;;  %s2547_s2 = sld [smem:[#allocation24_spill]] }
 0x70a   : > { %s2548_s14 = sld [smem:[#allocation31_spill]]  ;;  %s1168_s7 = sshll.u32 %s2305_s1, 4  ;;  %s1169_s7 = int_to_ptr.vmem [resolvable:$true] %s1168_s7 }
 0x70b   : > { %s1155_s10 = scalar_lea.sflag [#allocation5], %s2265_s22  ;;  %s1760_s16 = scalar_lea.vmem %s1169_s7, 128 }
 0x70c   : > { %p1761_p4 = scmp.ne.s32.totalorder %s1169_s7, %s1760_s16  ;;  %s1908_s17 = smov [#allocation11]  }
 0x70d   : > { %s1764_s18 = sshll.u32 %s1908_s17, 4  ;;  %s1765_s18 = int_to_ptr.vmem [resolvable:$false] %s1764_s18 }
 0x70e   : > { %s1766_s29 = scalar_lea.vmem %s1765_s18, 256  ;;  %p1767_p12 = scmp.lt.s32.totalorder %s1169_s7, %s1765_s18 }
 0x70f   : > { %s1386_s23 = sshll.u32 %s2546_s9, 7  ;;  %p2549_p0 = scmp.ne.s32.totalorder %s2547_s2, 0 }
 0x710   : > { %s2412_s8 = scalar_lea.hbm %s2548_s14, %s1386_s23  ;;  %p1768_p1 = scmp.lt.s32.totalorder %s1766_s29, %s1760_s16 }
 0x711   : > { %p1762_p6 = pnand %p1761_p4, %p2549_p0 }
 0x712   : > { %p1769_p11 = por %p1768_p1, %p1767_p12 }
 0x713   : > { %p1763_p3 = pneg %p1762_p6 }
 0x715   : > { %p1770_p2 = pnand %p1769_p11, %p1763_p3 }
 0x717   : > { %1773 = shalt.err (!%p1770_p2)
}
 0x718   : > { %s1774_s22 = scalar_lea.hbm %s2412_s8, 128  ;;  %s1778_s19 = scalar_lea.hbm %s2548_s14, 256 }
 0x719   : > { %p1775_p9 = scmp.ne.s32.totalorder %s2412_s8, %s1774_s22  ;;  %p1779_p10 = scmp.lt.u32.totalorder %s2412_s8, %s2548_s14 }
 0x71a   : > { %p1780_p7 = scmp.lt.u32.totalorder %s1778_s19, %s1774_s22  ;;  %p1782_p4 = scmp.lt.u32.totalorder %s1774_s22, %s2412_s8 }
 0x71b   : > { %p1776_p5 = pnand %p1775_p9, %p2549_p0 }
 0x71c   : > { %p1781_p8 = por %p1780_p7, %p1779_p10 }
 0x71d   : > { %p1777_p13 = pneg %p1776_p5 }
 0x71e   : > { %p1783_p6 = por %p1782_p4, %p1781_p8 }
 0x720   : > { %p1784_p3 = pnand %p1783_p6, %p1777_p13 }
 0x722   : > { %1787 = shalt.err (!%p1784_p3)
}
 0x723   : > { %1497 = dma.vmem_to_hbm [thread:$0]  (%p2549_p0), %s1169_s7, 128, %s2412_s8, %s1155_s10  }
 0x724 PF: > { %s2550_s4 = sld [smem:[#allocation26_spill]]  ;;  %p1517_p12 = scmp.ge.s32.totalorder %s1890_s11, 2 }
 0x725   : > { %s1180_s12 = sand.u32 1, %s1862_s27  }
 0x726   : > { %s1181_s6 = scalar_lea.sflag [#allocation5], %s1180_s12 }
 0x72a   : > { %p2551_p1 = scmp.ne.s32.totalorder %s2550_s4, 0 }
 0x72c   : > { %p1513_p11 = pnand %p1517_p12, %p2551_p1 }
 0x72e   : > { %1845 = dma.done.wait (!%p1513_p11), %s1181_s6, 128  }
 0x72f   : > { %1847 = vsyncadd (!%p1513_p11), %s1181_s6, 4294967168  ;;  %s29_s11 = sadd.s32 1, %s1890_s11   ;;  %s2552_s9 = sld [smem:[#allocation22_spill]] }
 0x730   : > { %p26_p2 = scmp.ge.s32.totalorder %s29_s11, 6   ;;  %s2553_s2 = sld [smem:[#allocation16_spill]] }
 0x731   : > { %s2554_s29 = sld [smem:[#allocation25_spill]]  ;;  %s2555_s30 = sld [smem:[#allocation19_spill]] }
 0x732   : > { %s2556_s8 = sld [smem:[#allocation20_spill]]  ;;  %s2557_s23 = sld [smem:[#allocation21_spill]] }
 0x733   : > { %s2558_s10 = sld [smem:[#allocation23_spill]]  ;;  %s2559_s24 = smov %s1854_s25 }
 0x734   : > { %s2560_s25 = smov %s1858_s26  ;;  %s2562_s27 = smov %s1866_s28 }
 0x735   : > { %s2561_s26 = smov %s2552_s9  ;;  %28 = sbr.rel (!%p26_p2) target bundleno = 19 (0x13), region = 147 }
 0x736   : > { %s2563_s28 = smov %s2553_s2 }
 0x738   : > { %s2564_s9 = smov %s2557_s23 }
 0x73c   :  { %1186 = vsyncpa [#allocation4], 1 }
 0x73d   :  { %1188 = vsyncpa [#allocation4 + $0x1], 1 }
 0x73e   :  { %1189 = vsyncpa [#allocation7], 1 }
 0x73f   :  { %1191 = vsyncpa [#allocation7 + $0x1], 1 }
 0x740   :  { %1192 = vsyncpa [#allocation10], 1 }
 0x741   :  { %1194 = vsyncpa [#allocation10 + $0x1], 1 }
 0x742   :  { %1195 = vsyncpa [#allocation5], 1 }
 0x743   :  { %1197 = vsyncpa [#allocation5 + $0x1], 1 }

</bundles_post_ra>
